<compile_context>
chip_gen: v6e
topology: v6e:2x2x1
jax: 0.10.0
libtpu: 0.0.40
codegen_flags: <defaults>
</compile_context>

<pallas_src>
import functools

import jax
import jax.numpy as jnp
from jax.experimental import pallas as pl
from jax.experimental.pallas import tpu as pltpu


def _tpe_kernel(x_ref, tp_ref, o_ref, *, bsz, embed):
    # x_ref : (TS, B*E)    = x[s0:s0+TS].reshape(TS, B*E)      (contiguous slab)
    # tp_ref: (B, TS, E)   = time_position[:, s0:s0+TS, :]      (B contiguous runs)
    # o_ref : (TS, B*E)    = out[s0:s0+TS].reshape(TS, B*E)     (contiguous slab)
    #
    # Static per-batch lane windows: column block [b*E, (b+1)*E) of x/out is
    # exactly time_position[b]'s (TS, E) tile, so no transpose/relayout is
    # needed -- just full-width loads, one add, and a lane-dense store.
    for b in range(bsz):
        lo = b * embed
        hi = lo + embed
        o_ref[:, lo:hi] = (x_ref[:, lo:hi] + tp_ref[b]).astype(o_ref.dtype)


def _pick_seq_tile(S, bytes_per_row, sublane, target_step_bytes):
    """Rows of the seq axis per grid step.

    Budgeted by total per-step bytes across all three operands; TS is a
    multiple of `sublane` (second-minor constraint of the tp block) or the
    full extent S.  TS need not divide S (ragged last block is masked)."""
    cap = target_step_bytes // max(1, bytes_per_row)
    if cap >= S:
        return S                       # whole array fits in one step's budget
    ts = max(sublane, (cap // sublane) * sublane)
    return min(ts, S)


def _even_tile_count(S, ts, sublane):
    """Best-effort: shrink TS slightly (<=1/3) so the parallel grid axis has an
    even extent -> balanced 2-TensorCore sharding on v7x (no-op elsewhere)."""
    n = pl.cdiv(S, ts)
    if n <= 1 or n % 2 == 0 or ts <= sublane:
        return ts
    floor = max(sublane, (2 * ts) // 3)
    t = ts - sublane
    while t >= floor:
        if pl.cdiv(S, t) % 2 == 0:
            return t
        t -= sublane
    return ts


def time_positional_encoding(x, time_position, *, target_step_bytes=6 << 20):
    """out[s, b, e] = x[s, b, e] + time_position[b, s, e]."""
    S, B, E = x.shape
    assert time_position.shape == (B, S, E), "time_position must be (B, S, E)"

    out_dtype = jnp.promote_types(x.dtype, time_position.dtype)
    itemsizes = (
        jnp.dtype(x.dtype).itemsize,
        jnp.dtype(time_position.dtype).itemsize,
        jnp.dtype(out_dtype).itemsize,
    )
    bytes_per_row = B * E * sum(itemsizes)
    # Sublane multiple for the (TS, ...) second-minor dims: 8 (f32) / 16 (bf16)
    # / 32 (int8) based on the narrowest dtype involved.
    sublane = max(8, 32 // max(1, min(itemsizes)))

    TS = _pick_seq_tile(S, bytes_per_row, sublane, target_step_bytes)
    TS = _even_tile_count(S, TS, sublane)
    n_tiles = pl.cdiv(S, TS)

    # Free row-major views: (S, B, E) <-> (S, B*E).  The permuted access into
    # time_position is handled by its own contiguous (B, TS, E) block plus the
    # static per-batch lane windows inside the kernel.
    x_flat = x.reshape(S, B * E)

    kernel = functools.partial(_tpe_kernel, bsz=B, embed=E)

    out_flat = pl.pallas_call(
        kernel,
        out_shape=jax.ShapeDtypeStruct((S, B * E), out_dtype),
        grid=(n_tiles,),
        in_specs=[
            pl.BlockSpec((TS, B * E), lambda i: (i, 0)),   # x   (one contiguous run)
            pl.BlockSpec((B, TS, E), lambda i: (0, i, 0)),  # tp  (B contiguous runs)
        ],
        out_specs=pl.BlockSpec((TS, B * E), lambda i: (i, 0)),
        compiler_params=pltpu.CompilerParams(
            dimension_semantics=("parallel",),
            vmem_limit_bytes=32 << 20,   # headroom for ~12 MiB of double-buffered tiles
        ),
    )(x_flat, time_position)

    return out_flat.reshape(S, B, E)


if __name__ == "__main__":
    key = jax.random.PRNGKey(0)
    kx, kt = jax.random.split(key)

    def ref_fn(x, tp):
        # Pure-JAX reference reproducing the PyTorch forward exactly.
        return jnp.transpose(jnp.transpose(x, (1, 0, 2)) + tp, (1, 0, 2))

    # Main small config: seq=16, batch=4, embed=128 (single full-extent tile).
    S, B, E = 16, 4, 128
    x = jax.random.normal(kx, (S, B, E), dtype=jnp.float32)
    time_position = jax.random.normal(kt, (B, S, E), dtype=jnp.float32)
    out = jax.block_until_ready(time_positional_encoding(x, time_position))
    ref = ref_fn(x, time_position)
    assert out.shape == ref.shape and out.dtype == ref.dtype
    assert jnp.allclose(out, ref, atol=1e-6), "mismatch vs reference (main)"

    # Multi-tile + ragged-edge config: S=20 with a forced 8-row tile -> grid of
    # 3 steps, last block masked (exercises the cdiv / non-dividing-TS path).
    S2, B2, E2 = 20, 2, 128
    x2 = jax.random.normal(kx, (S2, B2, E2), dtype=jnp.float32)
    tp2 = jax.random.normal(kt, (B2, S2, E2), dtype=jnp.float32)
    out2 = jax.block_until_ready(
        time_positional_encoding(x2, tp2, target_step_bytes=8 * 1024))
    assert jnp.allclose(out2, ref_fn(x2, tp2), atol=1e-6), "mismatch vs reference (ragged)"

    print("KERNEL_OK")
</pallas_src>

<mosaic_0001>
module attributes {stable_mosaic.version = 11 : i64} {
  func.func @_tpe_kernel(%arg0: i32, %arg1: memref<16x512xf32, #tpu.memory_space<vmem>>, %arg2: memref<4x16x128xf32, #tpu.memory_space<vmem>>, %arg3: memref<16x512xf32, #tpu.memory_space<vmem>>) attributes {dimension_semantics = [#tpu.dimension_semantics<parallel>], iteration_bounds = array<i64: 1>, scalar_prefetch = 0 : i64, scratch_operands = 0 : i64, tpu.core_type = #tpu.core_type<tc>, window_params = [{transform_indices = @transform_0, window_bounds = array<i64: 16, 512>}, {transform_indices = @transform_1, window_bounds = array<i64: 4, 16, 128>}, {transform_indices = @transform_2, window_bounds = array<i64: 16, 512>}]} {
    %c0 = arith.constant 0 : index
    %c0_0 = arith.constant 0 : index
    %0 = vector.load %arg1[%c0, %c0_0] : memref<16x512xf32, #tpu.memory_space<vmem>>, vector<16x128xf32>
    %c0_1 = arith.constant 0 : index
    %c0_2 = arith.constant 0 : index
    %c0_3 = arith.constant 0 : index
    %1 = vector.load %arg2[%c0_1, %c0_2, %c0_3] : memref<4x16x128xf32, #tpu.memory_space<vmem>>, vector<1x16x128xf32>
    %2 = vector.shape_cast %1 : vector<1x16x128xf32> to vector<16x128xf32>
    %3 = arith.addf %0, %2 : vector<16x128xf32>
    %c0_4 = arith.constant 0 : index
    %c0_5 = arith.constant 0 : index
    %4 = vector.load %arg3[%c0_4, %c0_5] : memref<16x512xf32, #tpu.memory_space<vmem>>, vector<16x128xf32>
    tpu.vector_store %arg3[%c0_4, %c0_5], %3 {strides = array<i32>} : memref<16x512xf32, #tpu.memory_space<vmem>>, vector<16x128xf32>,
    %c0_6 = arith.constant 0 : index
    %c128 = arith.constant 128 : index
    %5 = vector.load %arg1[%c0_6, %c128] : memref<16x512xf32, #tpu.memory_space<vmem>>, vector<16x128xf32>
    %c1 = arith.constant 1 : index
    %c0_7 = arith.constant 0 : index
    %c0_8 = arith.constant 0 : index
    %6 = vector.load %arg2[%c1, %c0_7, %c0_8] : memref<4x16x128xf32, #tpu.memory_space<vmem>>, vector<1x16x128xf32>
    %7 = vector.shape_cast %6 : vector<1x16x128xf32> to vector<16x128xf32>
    %8 = arith.addf %5, %7 : vector<16x128xf32>
    %c0_9 = arith.constant 0 : index
    %c128_10 = arith.constant 128 : index
    %9 = vector.load %arg3[%c0_9, %c128_10] : memref<16x512xf32, #tpu.memory_space<vmem>>, vector<16x128xf32>
    tpu.vector_store %arg3[%c0_9, %c128_10], %8 {strides = array<i32>} : memref<16x512xf32, #tpu.memory_space<vmem>>, vector<16x128xf32>,
    %c0_11 = arith.constant 0 : index
    %c256 = arith.constant 256 : index
    %10 = vector.load %arg1[%c0_11, %c256] : memref<16x512xf32, #tpu.memory_space<vmem>>, vector<16x128xf32>
    %c2 = arith.constant 2 : index
    %c0_12 = arith.constant 0 : index
    %c0_13 = arith.constant 0 : index
    %11 = vector.load %arg2[%c2, %c0_12, %c0_13] : memref<4x16x128xf32, #tpu.memory_space<vmem>>, vector<1x16x128xf32>
    %12 = vector.shape_cast %11 : vector<1x16x128xf32> to vector<16x128xf32>
    %13 = arith.addf %10, %12 : vector<16x128xf32>
    %c0_14 = arith.constant 0 : index
    %c256_15 = arith.constant 256 : index
    %14 = vector.load %arg3[%c0_14, %c256_15] : memref<16x512xf32, #tpu.memory_space<vmem>>, vector<16x128xf32>
    tpu.vector_store %arg3[%c0_14, %c256_15], %13 {strides = array<i32>} : memref<16x512xf32, #tpu.memory_space<vmem>>, vector<16x128xf32>,
    %c0_16 = arith.constant 0 : index
    %c384 = arith.constant 384 : index
    %15 = vector.load %arg1[%c0_16, %c384] : memref<16x512xf32, #tpu.memory_space<vmem>>, vector<16x128xf32>
    %c3 = arith.constant 3 : index
    %c0_17 = arith.constant 0 : index
    %c0_18 = arith.constant 0 : index
    %16 = vector.load %arg2[%c3, %c0_17, %c0_18] : memref<4x16x128xf32, #tpu.memory_space<vmem>>, vector<1x16x128xf32>
    %17 = vector.shape_cast %16 : vector<1x16x128xf32> to vector<16x128xf32>
    %18 = arith.addf %15, %17 : vector<16x128xf32>
    %c0_19 = arith.constant 0 : index
    %c384_20 = arith.constant 384 : index
    %19 = vector.load %arg3[%c0_19, %c384_20] : memref<16x512xf32, #tpu.memory_space<vmem>>, vector<16x128xf32>
    tpu.vector_store %arg3[%c0_19, %c384_20], %18 {strides = array<i32>} : memref<16x512xf32, #tpu.memory_space<vmem>>, vector<16x128xf32>,
    return
  }
  func.func @transform_0(%arg0: i32) -> (i32, i32) {
    %c0_i32 = arith.constant 0 : i32
    %c0_i32_0 = arith.constant 0 : i32
    return %arg0, %c0_i32 : i32, i32
  }
  func.func @transform_1(%arg0: i32) -> (i32, i32, i32) {
    %c0_i32 = arith.constant 0 : i32
    %c0_i32_0 = arith.constant 0 : i32
    %c0_i32_1 = arith.constant 0 : i32
    return %c0_i32, %arg0, %c0_i32_0 : i32, i32, i32
  }
  func.func @transform_2(%arg0: i32) -> (i32, i32) {
    %c0_i32 = arith.constant 0 : i32
    %c0_i32_0 = arith.constant 0 : i32
    return %arg0, %c0_i32 : i32, i32
  }
}

</mosaic_0001>

<bundles_post_ra>
// kernel: tpu_custom_call.1
= control target key start
LH: loop header
LB: loop body
LE: loop exit
PB: predicated region body
PF: predicated region fallthrough
CT: control target
= control target key end

     0   :  { %7 = vsyncpa [#allocation3], 0  ;;  %s203_s0 = inlined_call_operand.hbm [shape: f32[16,512], index: 0, kind: input, shape index: {}]   ;;  %s204_s1 = inlined_call_operand.hbm [shape: f32[4,16,128], index: 1, kind: input, shape index: {}]   ;;  %s205_s2 = inlined_call_operand.hbm [shape: f32[16,512], index: 2, kind: output, shape index: {}]  }
   0x1   :  { %8 = vsyncpa [#allocation6], 0 }
   0x2   :  { %9 = vsyncpa [#allocation4], 0  ;;  %s166_s9 = smov [#allocation2]  }
   0x3   :  { %s15_s10 = sshll.u32 %s166_s9, 4  ;;  %s16_s10 = int_to_ptr.vmem [resolvable:$true] %s15_s10 }
   0x4   :  { %s108_s11 = scalar_lea.vmem %s16_s10, 1024  ;;  %p113_p1 = scmp.lt.s32.totalorder %s16_s10, %s16_s10 }
   0x5   :  { %p109_p0 = scmp.ne.s32.totalorder %s16_s10, %s108_s11  ;;  %p114_p2 = scmp.lt.s32.totalorder %s108_s11, %s108_s11 }
   0x7   :  { %p115_p3 = por %p114_p2, %p113_p1 }
   0x9   :  { %p116_p4 = pnand %p115_p3, %p109_p0 }
   0xb   :  { %119 = shalt.err (!%p116_p4)
}
   0xc   :  { %s167_s12 = smov 512   ;;  %s168_s13 = smov 32  }
   0xd   :  { %21 = dma.hbm_to_vmem [thread:$0]  %s203_s0, 1024, %s16_s10, [#allocation3], %s167_s12, %s167_s12, %s168_s13  }
   0xe   :  { %s169_s16 = smov [#allocation5]  }
   0xf   :  { %s27_s17 = sshll.u32 %s169_s16, 4  ;;  %s28_s17 = int_to_ptr.vmem [resolvable:$true] %s27_s17 }
  0x10   :  { %s128_s18 = scalar_lea.vmem %s28_s17, 1024  ;;  %p133_p6 = scmp.lt.s32.totalorder %s28_s17, %s28_s17 }
  0x11   :  { %p129_p5 = scmp.ne.s32.totalorder %s28_s17, %s128_s18  ;;  %p134_p7 = scmp.lt.s32.totalorder %s128_s18, %s128_s18 }
  0x13   :  { %p135_p8 = por %p134_p7, %p133_p6 }
  0x15   :  { %p136_p9 = pnand %p135_p8, %p129_p5 }
  0x17   :  { %139 = shalt.err (!%p136_p9)
}
  0x18   :  { %s170_s19 = smov 128   ;;  %s171_s20 = smov 8  }
  0x19   :  { %33 = dma.hbm_to_vmem [thread:$0]  %s204_s1, 1024, %s28_s17, [#allocation6], %s170_s19, %s170_s19, %s171_s20  }
  0x1a   :  { %160 = dma.done.wait [#allocation3], 1024  }
  0x1b   :  { %161 = vsyncadd [#allocation3], 4294966272 }
  0x1c   :  { %162 = dma.done.wait [#allocation6], 1024  }
  0x1d   :  { %163 = vsyncadd [#allocation6], 4294966272  ;;  %v40_v0 = vld [vmem:[#allocation2] sm:$0xff]  ;;  %v43_v4 = vld [vmem:[#allocation5 + $0x8] sm:$0xff]  ;;  %s172_s0 = smov [#allocation7]  }
  0x1e   :  { %v42_v1 = vld [vmem:[#allocation5] sm:$0xff]  ;;  %v48_v5 = vld [vmem:[#allocation2 + $0x8] sm:$0xff]  ;;  %v51_v6 = vld [vmem:[#allocation5 + $0x10] sm:$0xff]  ;;  %s80_s1 = sshll.u32 %s172_s0, 4  ;;  %s81_s1 = int_to_ptr.vmem [resolvable:$true] %s80_s1 }
  0x1f   :  { %v41_v2 = vld [vmem:[#allocation2 + $0x20] sm:$0xff]  ;;  %v44_v3 = vadd.f32 %v42_v1, %v40_v0  ;;  %v53_v8 = vadd.f32 %v51_v6, %v48_v5  ;;  %v49_v9 = vld [vmem:[#allocation2 + $0x28] sm:$0xff]  ;;  %v52_v10 = vld [vmem:[#allocation5 + $0x18] sm:$0xff]  ;;  %s140_s23 = scalar_lea.vmem %s81_s1, 1024  ;;  %p145_p11 = scmp.lt.s32.totalorder %s81_s1, %s81_s1 }
  0x20   :  { %v45_v7 = vadd.f32 %v43_v4, %v41_v2  ;;  %v57_v11 = vld [vmem:[#allocation2 + $0x10] sm:$0xff]  ;;  %v54_v12 = vadd.f32 %v52_v10, %v49_v9  ;;  %v60_v13 = vld [vmem:[#allocation5 + $0x20] sm:$0xff]  ;;  %v61_v15 = vld [vmem:[#allocation5 + $0x28] sm:$0xff]  ;;  %p141_p10 = scmp.ne.s32.totalorder %s81_s1, %s140_s23  ;;  %p146_p12 = scmp.lt.s32.totalorder %s140_s23, %s140_s23 }
  0x21   :  { %46 = vst [vmem:[#allocation7] sm:$0xff] %v44_v3  ;;  %v58_v14 = vld [vmem:[#allocation2 + $0x30] sm:$0xff]  ;;  %55 = vst [vmem:[#allocation7 + $0x8] sm:$0xff] %v53_v8  ;;  %v62_v16 = vadd.f32 %v60_v13, %v57_v11  ;;  %v66_v18 = vld [vmem:[#allocation2 + $0x18] sm:$0xff] }
  0x22   :  { %47 = vst [vmem:[#allocation7 + $0x20] sm:$0xff] %v45_v7  ;;  %v63_v17 = vadd.f32 %v61_v15, %v58_v14  ;;  %v69_v19 = vld [vmem:[#allocation5 + $0x30] sm:$0xff]  ;;  %v67_v20 = vld [vmem:[#allocation2 + $0x38] sm:$0xff]  ;;  %56 = vst [vmem:[#allocation7 + $0x28] sm:$0xff] %v54_v12  ;;  %p147_p13 = por %p146_p12, %p145_p11 }
  0x23   :  { %v71_v21 = vadd.f32 %v69_v19, %v66_v18  ;;  %v70_v22 = vld [vmem:[#allocation5 + $0x38] sm:$0xff]  ;;  %64 = vst [vmem:[#allocation7 + $0x10] sm:$0xff] %v62_v16 }
  0x24   :  { %65 = vst [vmem:[#allocation7 + $0x30] sm:$0xff] %v63_v17  ;;  %v72_v23 = vadd.f32 %v70_v22, %v67_v20  ;;  %p148_p0 = pnand %p147_p13, %p141_p10 }
  0x25   :  { %73 = vst [vmem:[#allocation7 + $0x18] sm:$0xff] %v71_v21 }
  0x26   :  { %74 = vst [vmem:[#allocation7 + $0x38] sm:$0xff] %v72_v23 }
  0x27   :  { %151 = shalt.err (!%p148_p0)
}
  0x28   :  { %86 = dma.vmem_to_hbm [thread:$0]  %s81_s1, 1024, %s205_s2, [#allocation4], %s167_s12, %s167_s12, %s168_s13  }
  0x29   :  { %164 = dma.done.wait [#allocation4], 1024  }
  0x2a   :  { %165 = vsyncadd [#allocation4], 4294966272 }
  0x2b   :  { %90 = vsyncpa [#allocation3], 1 }
  0x2c   :  { %91 = vsyncpa [#allocation6], 1 }
  0x2d   :  { %92 = vsyncpa [#allocation4], 1 }

</bundles_post_ra>
